<compile_context>
chip_gen: v6e
topology: v6e:2x2x1
jax: 0.10.0
libtpu: 0.0.40
codegen_flags: <defaults>
</compile_context>

<pallas_src>
import functools

import jax
import jax.numpy as jnp
from jax import lax
from jax.experimental import pallas as pl
from jax.experimental.pallas import tpu as pltpu

DROPOUT_P = 0.2
IN_F = 28 * 28        # 784
H1 = 128
H2 = 64
H2P = 128             # H2 zero-padded to a full lane width (exact)
OUT_F = 10
OUT_PAD = 128         # lane-dense (padded) logits width


def _round_up(n, m):
    return ((n + m - 1) // m) * m


def _mix_u32(x):
    """murmur3 fmix32 finalizer — per-element stateless PRNG bits."""
    x = x ^ (x >> 16)
    x = x * jnp.uint32(0x7FEB352D)
    x = x ^ (x >> 15)
    x = x * jnp.uint32(0x846CA68B)
    x = x ^ (x >> 16)
    return x


def _make_mlp_kernel(training: bool, p: float = DROPOUT_P):
    def kernel(seed_ref, x_ref, w1_ref, b1_ref, w2_ref, b2_ref, w3_ref, b3_ref, o_ref):
        # Cast x fp32 -> bf16 in-kernel (saves a full HBM pass in the wrapper).
        x = x_ref[...].astype(jnp.bfloat16)                       # (tile_b, 784)

        # fc1 + ReLU
        h1 = jnp.dot(x, w1_ref[...], preferred_element_type=jnp.float32)
        h1 = jnp.maximum(h1 + b1_ref[...], 0.0)                   # (tile_b, 128) fp32

        if training:
            # TODO(synk): mask stream is statistically equivalent to torch Dropout(0.2)
            # but not bitwise identical to torch's RNG.
            tile_b = x_ref.shape[0]
            seed_u32 = seed_ref[0].astype(jnp.uint32)
            row0 = (pl.program_id(0) * tile_b).astype(jnp.uint32)
            # One (tile_b, 128) hash stream keyed on (seed, global row, col); layer-1
            # mask from the low 16 bits, layer-2 mask from the high 16 bits.
            rows = lax.broadcasted_iota(jnp.uint32, h1.shape, 0) + row0
            cols = lax.broadcasted_iota(jnp.uint32, h1.shape, 1)
            bits = _mix_u32((rows * jnp.uint32(0x9E3779B9)
                             + cols * jnp.uint32(0x85EBCA6B)) ^ seed_u32)
            thresh = jnp.uint32(int(round(p * 65536.0)))          # drop iff bits16 < thresh
            scale = jnp.float32(1.0 / (1.0 - p))
            keep1 = (bits & jnp.uint32(0xFFFF)) >= thresh
            keep2 = (bits >> 16) >= thresh
            # scale folded into the mask -> one VPU multiply per layer
            h1 = h1 * jnp.where(keep1, scale, jnp.float32(0.0))

        # fc2 + ReLU  (H2 zero-padded 64 -> 128; padded lanes stay exactly zero)
        h2 = jnp.dot(h1.astype(jnp.bfloat16), w2_ref[...],
                     preferred_element_type=jnp.float32)
        h2 = jnp.maximum(h2 + b2_ref[...], 0.0)                   # (tile_b, 128) fp32
        if training:
            h2 = h2 * jnp.where(keep2, scale, jnp.float32(0.0))

        # fc3 (logits; lane-padded to 128 wide, cols >= 10 are zero) -> bf16 writeback
        out = jnp.dot(h2.astype(jnp.bfloat16), w3_ref[...],
                      preferred_element_type=jnp.float32)
        o_ref[...] = (out + b3_ref[...]).astype(o_ref.dtype)

    return kernel


@functools.partial(jax.jit, static_argnames=("training",))
def neural_net_with_dropout(x, params, seed, *, training=False):
    """Forward pass of NeuralNetWithDropout.

    x: (B, 1, 28, 28) or (B, 784) float32
    params: PyTorch-style w1(128,784) b1(128,) w2(64,128) b2(64,) w3(10,64) b3(10,)
    seed: int32 scalar (only used when training=True)
    """
    B = x.shape[0]
    x2 = x.reshape(B, IN_F)                      # x.view(-1, 784); stays fp32 (no extra pass)

    # Batch tile: multiple of 8 (sublane), aim for ~8 grid steps so v7x's two
    # TensorCores both get work, cap at 1024 rows so the double-buffered fp32 x
    # tile (~6.4 MiB x2) stays well inside the 32 MiB scoped VMEM limit.
    tile_b = min(1024, max(8, _round_up(pl.cdiv(B, 8), 8)))
    grid_b = pl.cdiv(B, tile_b)                  # ragged last tile handled by Pallas

    # Weights (in, out) bf16 for the MXU; biases fp32 (1, out).
    # fc2/fc3 padded so every hidden/output slab is a full 128 lanes (exact: zeros).
    w1 = params["w1"].T.astype(jnp.bfloat16)                            # (784, 128)
    w2 = jnp.pad(params["w2"].T.astype(jnp.bfloat16),
                 ((0, 0), (0, H2P - H2)))                               # (128, 128)
    w3 = jnp.pad(params["w3"].T.astype(jnp.bfloat16),
                 ((0, H2P - H2), (0, OUT_PAD - OUT_F)))                 # (128, 128)
    b1 = params["b1"].astype(jnp.float32).reshape(1, -1)                # (1, 128)
    b2 = jnp.pad(params["b2"].astype(jnp.float32),
                 (0, H2P - H2)).reshape(1, -1)                          # (1, 128)
    b3 = jnp.pad(params["b3"].astype(jnp.float32),
                 (0, OUT_PAD - OUT_F)).reshape(1, -1)                   # (1, 128)

    seed_arr = jnp.asarray(seed, dtype=jnp.int32).reshape(1)

    grid_spec = pltpu.PrefetchScalarGridSpec(
        num_scalar_prefetch=1,
        grid=(grid_b,),
        in_specs=[
            pl.BlockSpec((tile_b, IN_F), lambda i, seed: (i, 0)),   # x: pipelined per tile
            pl.BlockSpec((IN_F, H1),     lambda i, seed: (0, 0)),   # w1: VMEM-resident
            pl.BlockSpec((1, H1),        lambda i, seed: (0, 0)),
            pl.BlockSpec((H1, H2P),      lambda i, seed: (0, 0)),
            pl.BlockSpec((1, H2P),       lambda i, seed: (0, 0)),
            pl.BlockSpec((H2P, OUT_PAD), lambda i, seed: (0, 0)),
            pl.BlockSpec((1, OUT_PAD),   lambda i, seed: (0, 0)),
        ],
        out_specs=pl.BlockSpec((tile_b, OUT_PAD), lambda i, seed: (i, 0)),
    )

    out = pl.pallas_call(
        _make_mlp_kernel(training),
        out_shape=jax.ShapeDtypeStruct((B, OUT_PAD), jnp.bfloat16),
        grid_spec=grid_spec,
        compiler_params=pltpu.CompilerParams(
            dimension_semantics=("parallel",),          # megacore sharding on v7x
            vmem_limit_bytes=32 * 1024 * 1024,          # explicit (v5e default is 16 MiB)
        ),
    )(seed_arr, x2, w1, b1, w2, b2, w3, b3)

    return out[:, :OUT_F].astype(jnp.float32)


def init_params(key):
    """PyTorch nn.Linear default init: U(-k, k), k = 1/sqrt(fan_in)."""
    def linear(key, out_f, in_f):
        kw, kb = jax.random.split(key)
        bound = 1.0 / (in_f ** 0.5)
        w = jax.random.uniform(kw, (out_f, in_f), jnp.float32, -bound, bound)
        b = jax.random.uniform(kb, (out_f,), jnp.float32, -bound, bound)
        return w, b

    k1, k2, k3 = jax.random.split(key, 3)
    w1, b1 = linear(k1, H1, IN_F)
    w2, b2 = linear(k2, H2, H1)
    w3, b3 = linear(k3, OUT_F, H2)
    return {"w1": w1, "b1": b1, "w2": w2, "b2": b2, "w3": w3, "b3": b3}


if __name__ == "__main__":
    key = jax.random.PRNGKey(0)
    k_params, k_x = jax.random.split(key)

    params = init_params(k_params)
    batch = 8
    x = jax.random.normal(k_x, (batch, 1, 28, 28), dtype=jnp.float32)
    seed = jnp.int32(0)

    # Eval mode (dropout = identity) — matches model.eval() semantics.
    logits_eval = neural_net_with_dropout(x, params, seed, training=False)
    jax.block_until_ready(logits_eval)

    # Pure-JAX reference with the same bf16-weight / fp32-accumulate recipe.
    xf = x.reshape(batch, -1).astype(jnp.bfloat16)
    w1 = params["w1"].T.astype(jnp.bfloat16)
    w2 = params["w2"].T.astype(jnp.bfloat16)
    w3 = params["w3"].T.astype(jnp.bfloat16)
    h = jnp.maximum(jnp.dot(xf, w1, preferred_element_type=jnp.float32) + params["b1"], 0.0)
    h = jnp.maximum(jnp.dot(h.astype(jnp.bfloat16), w2,
                            preferred_element_type=jnp.float32) + params["b2"], 0.0)
    ref = jnp.dot(h.astype(jnp.bfloat16), w3,
                  preferred_element_type=jnp.float32) + params["b3"]

    assert logits_eval.shape == (batch, 10)
    assert jnp.allclose(logits_eval, ref, atol=5e-2, rtol=5e-2), (
        float(jnp.max(jnp.abs(logits_eval - ref))))

    # Training mode exercises the in-kernel (stateless, counter-based) dropout.
    logits_train = neural_net_with_dropout(x, params, seed, training=True)
    jax.block_until_ready(logits_train)
    assert logits_train.shape == (batch, 10)
    assert bool(jnp.all(jnp.isfinite(logits_train)))

    print("KERNEL_OK")
</pallas_src>

<mosaic_0001>
module attributes {stable_mosaic.version = 11 : i64} {
  func.func @kernel(%arg0: i32, %arg1: memref<1xi32, #tpu.memory_space<smem>>, %arg2: memref<8x784xf32, #tpu.memory_space<vmem>>, %arg3: memref<784x128xbf16, #tpu.memory_space<vmem>>, %arg4: memref<1x128xf32, #tpu.memory_space<vmem>>, %arg5: memref<128x128xbf16, #tpu.memory_space<vmem>>, %arg6: memref<1x128xf32, #tpu.memory_space<vmem>>, %arg7: memref<128x128xbf16, #tpu.memory_space<vmem>>, %arg8: memref<1x128xf32, #tpu.memory_space<vmem>>, %arg9: memref<8x128xbf16, #tpu.memory_space<vmem>>) attributes {dimension_semantics = [#tpu.dimension_semantics<parallel>], iteration_bounds = array<i64: 1>, scalar_prefetch = 1 : i64, scratch_operands = 0 : i64, tpu.core_type = #tpu.core_type<tc>, window_params = [{transform_indices = @transform_0, window_bounds = array<i64: 8, 784>}, {pipeline_mode = #tpu.pipeline_mode<synchronous>, transform_indices = @transform_1, window_bounds = array<i64: 784, 128>}, {pipeline_mode = #tpu.pipeline_mode<synchronous>, transform_indices = @transform_2, window_bounds = array<i64: 1, 128>}, {pipeline_mode = #tpu.pipeline_mode<synchronous>, transform_indices = @transform_3, window_bounds = array<i64: 128, 128>}, {pipeline_mode = #tpu.pipeline_mode<synchronous>, transform_indices = @transform_4, window_bounds = array<i64: 1, 128>}, {pipeline_mode = #tpu.pipeline_mode<synchronous>, transform_indices = @transform_5, window_bounds = array<i64: 128, 128>}, {pipeline_mode = #tpu.pipeline_mode<synchronous>, transform_indices = @transform_6, window_bounds = array<i64: 1, 128>}, {transform_indices = @transform_7, window_bounds = array<i64: 8, 128>}]} {
    %c0 = arith.constant 0 : index
    %c0_0 = arith.constant 0 : index
    %0 = vector.load %arg2[%c0, %c0_0] : memref<8x784xf32, #tpu.memory_space<vmem>>, vector<8x784xf32>
    %1 = arith.truncf %0 : vector<8x784xf32> to vector<8x784xbf16>
    %c0_1 = arith.constant 0 : index
    %c0_2 = arith.constant 0 : index
    %2 = vector.load %arg3[%c0_1, %c0_2] : memref<784x128xbf16, #tpu.memory_space<vmem>>, vector<784x128xbf16>
    %cst = arith.constant dense<0.000000e+00> : vector<8x128xf32>
    %3 = tpu.matmul %1, %2, %cst {dimension_numbers = #tpu.dot_dimension_numbers<[1], [0], [0], [1], [0, 0, 1, 1], [], []>} : vector<8x784xbf16>, vector<784x128xbf16>, vector<8x128xf32> -> vector<8x128xf32>
    %c0_3 = arith.constant 0 : index
    %c0_4 = arith.constant 0 : index
    %4 = vector.load %arg4[%c0_3, %c0_4] : memref<1x128xf32, #tpu.memory_space<vmem>>, vector<1x128xf32>
    %5 = vector.broadcast %4 : vector<1x128xf32> to vector<8x128xf32>
    %6 = arith.addf %3, %5 : vector<8x128xf32>
    %cst_5 = arith.constant 0.000000e+00 : f32
    %7 = vector.broadcast %cst_5 : f32 to vector<8x128xf32>
    %8 = arith.maximumf %6, %7 : vector<8x128xf32>
    %9 = arith.truncf %8 : vector<8x128xf32> to vector<8x128xbf16>
    %c0_6 = arith.constant 0 : index
    %c0_7 = arith.constant 0 : index
    %10 = vector.load %arg5[%c0_6, %c0_7] : memref<128x128xbf16, #tpu.memory_space<vmem>>, vector<128x128xbf16>
    %cst_8 = arith.constant dense<0.000000e+00> : vector<8x128xf32>
    %11 = tpu.matmul %9, %10, %cst_8 {dimension_numbers = #tpu.dot_dimension_numbers<[1], [0], [0], [1], [0, 0, 1, 1], [], []>} : vector<8x128xbf16>, vector<128x128xbf16>, vector<8x128xf32> -> vector<8x128xf32>
    %c0_9 = arith.constant 0 : index
    %c0_10 = arith.constant 0 : index
    %12 = vector.load %arg6[%c0_9, %c0_10] : memref<1x128xf32, #tpu.memory_space<vmem>>, vector<1x128xf32>
    %13 = vector.broadcast %12 : vector<1x128xf32> to vector<8x128xf32>
    %14 = arith.addf %11, %13 : vector<8x128xf32>
    %cst_11 = arith.constant 0.000000e+00 : f32
    %15 = vector.broadcast %cst_11 : f32 to vector<8x128xf32>
    %16 = arith.maximumf %14, %15 : vector<8x128xf32>
    %17 = arith.truncf %16 : vector<8x128xf32> to vector<8x128xbf16>
    %c0_12 = arith.constant 0 : index
    %c0_13 = arith.constant 0 : index
    %18 = vector.load %arg7[%c0_12, %c0_13] : memref<128x128xbf16, #tpu.memory_space<vmem>>, vector<128x128xbf16>
    %cst_14 = arith.constant dense<0.000000e+00> : vector<8x128xf32>
    %19 = tpu.matmul %17, %18, %cst_14 {dimension_numbers = #tpu.dot_dimension_numbers<[1], [0], [0], [1], [0, 0, 1, 1], [], []>} : vector<8x128xbf16>, vector<128x128xbf16>, vector<8x128xf32> -> vector<8x128xf32>
    %c0_15 = arith.constant 0 : index
    %c0_16 = arith.constant 0 : index
    %20 = vector.load %arg8[%c0_15, %c0_16] : memref<1x128xf32, #tpu.memory_space<vmem>>, vector<1x128xf32>
    %21 = vector.broadcast %20 : vector<1x128xf32> to vector<8x128xf32>
    %22 = arith.addf %19, %21 : vector<8x128xf32>
    %23 = arith.truncf %22 : vector<8x128xf32> to vector<8x128xbf16>
    %c0_17 = arith.constant 0 : index
    %c0_18 = arith.constant 0 : index
    %24 = vector.load %arg9[%c0_17, %c0_18] : memref<8x128xbf16, #tpu.memory_space<vmem>>, vector<8x128xbf16>
    tpu.vector_store %arg9[%c0_17, %c0_18], %23 {strides = array<i32>} : memref<8x128xbf16, #tpu.memory_space<vmem>>, vector<8x128xbf16>,
    return
  }
  func.func @transform_0(%arg0: i32, %arg1: memref<1xi32, #tpu.memory_space<smem>>) -> (i32, i32) {
    %c0_i32 = arith.constant 0 : i32
    %c0_i32_0 = arith.constant 0 : i32
    return %arg0, %c0_i32 : i32, i32
  }
  func.func @transform_1(%arg0: i32, %arg1: memref<1xi32, #tpu.memory_space<smem>>) -> (i32, i32) {
    %c0_i32 = arith.constant 0 : i32
    %c0_i32_0 = arith.constant 0 : i32
    %c0_i32_1 = arith.constant 0 : i32
    return %c0_i32, %c0_i32_0 : i32, i32
  }
  func.func @transform_2(%arg0: i32, %arg1: memref<1xi32, #tpu.memory_space<smem>>) -> (i32, i32) {
    %c0_i32 = arith.constant 0 : i32
    %c0_i32_0 = arith.constant 0 : i32
    %c0_i32_1 = arith.constant 0 : i32
    return %c0_i32, %c0_i32_0 : i32, i32
  }
  func.func @transform_3(%arg0: i32, %arg1: memref<1xi32, #tpu.memory_space<smem>>) -> (i32, i32) {
    %c0_i32 = arith.constant 0 : i32
    %c0_i32_0 = arith.constant 0 : i32
    %c0_i32_1 = arith.constant 0 : i32
    return %c0_i32, %c0_i32_0 : i32, i32
  }
  func.func @transform_4(%arg0: i32, %arg1: memref<1xi32, #tpu.memory_space<smem>>) -> (i32, i32) {
    %c0_i32 = arith.constant 0 : i32
    %c0_i32_0 = arith.constant 0 : i32
    %c0_i32_1 = arith.constant 0 : i32
    return %c0_i32, %c0_i32_0 : i32, i32
  }
  func.func @transform_5(%arg0: i32, %arg1: memref<1xi32, #tpu.memory_space<smem>>) -> (i32, i32) {
    %c0_i32 = arith.constant 0 : i32
    %c0_i32_0 = arith.constant 0 : i32
    %c0_i32_1 = arith.constant 0 : i32
    return %c0_i32, %c0_i32_0 : i32, i32
  }
  func.func @transform_6(%arg0: i32, %arg1: memref<1xi32, #tpu.memory_space<smem>>) -> (i32, i32) {
    %c0_i32 = arith.constant 0 : i32
    %c0_i32_0 = arith.constant 0 : i32
    %c0_i32_1 = arith.constant 0 : i32
    return %c0_i32, %c0_i32_0 : i32, i32
  }
  func.func @transform_7(%arg0: i32, %arg1: memref<1xi32, #tpu.memory_space<smem>>) -> (i32, i32) {
    %c0_i32 = arith.constant 0 : i32
    %c0_i32_0 = arith.constant 0 : i32
    return %arg0, %c0_i32 : i32, i32
  }
}

</mosaic_0001>

<bundles_post_ra>
// kernel: neural_net_with_dropout.1
= control target key start
LH: loop header
LB: loop body
LE: loop exit
PB: predicated region body
PF: predicated region fallthrough
CT: control target
= control target key end

     0   :  { %v1106_v44 = vmov 0.0   ;;  %vm1107_vm0 = vmmov 0   ;;  %vm442_vm1 = vcmask 130048   ;;  %s1404_s0 = inlined_call_operand.<no memory space> [shape: s32[1], index: 0, kind: input, shape index: {}]   ;;  %s1405_s2 = inlined_call_operand.vmem [shape: bf16[784,128], index: 2, kind: input, shape index: {}]   ;;  %s1406_s1 = inlined_call_operand.vmem [shape: f32[8,784], index: 1, kind: input, shape index: {}]   ;;  %s1407_s4 = inlined_call_operand.vmem [shape: bf16[128,128], index: 4, kind: input, shape index: {}]   ;;  %s1408_s6 = inlined_call_operand.vmem [shape: bf16[128,128], index: 6, kind: input, shape index: {}]   ;;  %s1409_s3 = inlined_call_operand.vmem [shape: f32[1,128], index: 3, kind: input, shape index: {}]   ;;  %s1410_s5 = inlined_call_operand.vmem [shape: f32[1,128], index: 5, kind: input, shape index: {}]   ;;  %s1411_s7 = inlined_call_operand.vmem [shape: f32[1,128], index: 7, kind: input, shape index: {}]   ;;  %s1412_s8 = inlined_call_operand.vmem [shape: bf16[8,128], index: 8, kind: output, shape index: {}]  }
   0x1   :  { %v1041_v0 = vld [vmem:[%s1405_s2 + $0x78] sm:$0xff]   ;;  %v1045_v4 = vld [vmem:[%s1405_s2 + $0x70] sm:$0xff]   ;;  %v1049_v8 = vld [vmem:[%s1405_s2 + $0x68] sm:$0xff]  }
   0x2   :  { %v1042_v1 = vld [vmem:[%s1405_s2 + $0x38] sm:$0xff]   ;;  %907 = vmatprep.subr.bf16.mxu0 %v1041_v0  ;;  %v1046_v5 = vld [vmem:[%s1405_s2 + $0x30] sm:$0xff]   ;;  %v1050_v9 = vld [vmem:[%s1405_s2 + $0x28] sm:$0xff]  }
   0x3   :  { %v1043_v2 = vld [vmem:[%s1405_s2 + $0xf8] sm:$0xff]   ;;  %908 = vmatpush3.bf16.msra.mxu0 %v1042_v1  ;;  %v1047_v6 = vld [vmem:[%s1405_s2 + $0xf0] sm:$0xff]   ;;  %v1051_v10 = vld [vmem:[%s1405_s2 + $0xe8] sm:$0xff]  }
   0x4   :  { %v1044_v3 = vld [vmem:[%s1405_s2 + $0xb8] sm:$0xff]   ;;  %929 = vmatprep.subr.bf16.mxu1 %v1043_v2  ;;  %909 = vmatprep.subr.bf16.mxu0 %v1045_v4  ;;  %v1048_v7 = vld [vmem:[%s1405_s2 + $0xb0] sm:$0xff]   ;;  %v1052_v11 = vld [vmem:[%s1405_s2 + $0xa8] sm:$0xff]  }
   0x5   :  { %930 = vmatpush3.bf16.msra.mxu1 %v1044_v3  ;;  %v1053_v12 = vld [vmem:[%s1405_s2 + $0x60] sm:$0xff]   ;;  %v1057_v16 = vld [vmem:[%s1405_s2 + $0x58] sm:$0xff]   ;;  %v1061_v20 = vld [vmem:[%s1405_s2 + $0x50] sm:$0xff]  }
   0x6   :  { %931 = vmatprep.subr.bf16.mxu1 %v1047_v6  ;;  %v1054_v13 = vld [vmem:[%s1405_s2 + $0x20] sm:$0xff]   ;;  %v1058_v17 = vld [vmem:[%s1405_s2 + $0x18] sm:$0xff]   ;;  %v1062_v21 = vld [vmem:[%s1405_s2 + $0x10] sm:$0xff]  }
   0x7   :  { %910 = vmatpush3.bf16.msra.mxu0 %v1046_v5  ;;  %v1055_v14 = vld [vmem:[%s1405_s2 + $0xe0] sm:$0xff]   ;;  %v1059_v18 = vld [vmem:[%s1405_s2 + $0xd8] sm:$0xff]   ;;  %v1063_v22 = vld [vmem:[%s1405_s2 + $0xd0] sm:$0xff]  }
   0x8   :  { %911 = vmatprep.subr.bf16.mxu0 %v1049_v8  ;;  %v1056_v15 = vld [vmem:[%s1405_s2 + $0xa0] sm:$0xff]   ;;  %v1060_v19 = vld [vmem:[%s1405_s2 + $0x98] sm:$0xff]   ;;  %v1064_v23 = vld [vmem:[%s1405_s2 + $0x90] sm:$0xff]  }
   0x9   :  { %932 = vmatpush3.bf16.msra.mxu1 %v1048_v7  ;;  %v1065_v24 = vld [vmem:[%s1405_s2 + $0x48] sm:$0xff]   ;;  %v1069_v28 = vld [vmem:[%s1405_s2 + $0x40] sm:$0xff]   ;;  %v1073_v36 = vld [vmem:[%s1405_s2 + $0x178] sm:$0xff]  }
   0xa   :  { %933 = vmatprep.subr.bf16.mxu1 %v1051_v10  ;;  %v1066_v25 = vld [vmem:[%s1405_s2 + $0x8] sm:$0xff]   ;;  %v1070_v29 = vld [vmem:[%s1405_s2] sm:$0xff]   ;;  %v32_v37 = vld [vmem:[%s1406_s1 + $0x18] sm:$0xff] }
   0xb   :  { %912 = vmatpush3.bf16.msra.mxu0 %v1050_v9  ;;  %v1067_v26 = vld [vmem:[%s1405_s2 + $0xc8] sm:$0xff]   ;;  %v1071_v30 = vld [vmem:[%s1405_s2 + $0xc0] sm:$0xff]   ;;  %v39_v38 = vpack.c.bf16 %v32_v37, %v32_v37  ;;  %v1074_v39 = vld [vmem:[%s1405_s2 + $0x138] sm:$0xff]  }
   0xc   :  { %913 = vmatprep.subr.bf16.mxu0 %v1053_v12  ;;  %v1068_v27 = vld [vmem:[%s1405_s2 + $0x88] sm:$0xff]   ;;  %v1072_v33 = vld [vmem:[%s1405_s2 + $0x80] sm:$0xff]   ;;  %v31_v40 = vld [vmem:[%s1406_s1 + $0x10] sm:$0xff] }
   0xd   :  { %934 = vmatpush3.bf16.msra.mxu1 %v1052_v11  ;;  %v30_v31 = vld [vmem:[%s1406_s1 + $0x8] sm:$0xff]  ;;  %v29_v34 = vld [vmem:[%s1406_s1] sm:$0xff]  ;;  %518 = vmatprep.mubr.bf16.mxu1 %v39_v38  ;;  %v38_v41 = vpack.c.bf16 %v31_v40, %v31_v40  ;;  %v1075_v42 = vld [vmem:[%s1405_s2 + $0x170] sm:$0xff]  }
   0xe   :  { %935 = vmatprep.subr.bf16.mxu1 %v1055_v14  ;;  %v37_v32 = vpack.c.bf16 %v30_v31, %v30_v31  ;;  %v36_v35 = vpack.c.bf16 %v29_v34, %v29_v34  ;;  %v1076_v43 = vld [vmem:[%s1405_s2 + $0x130] sm:$0xff]   ;;  %v1077_v45 = vld [vmem:[%s1405_s2 + $0x168] sm:$0xff]   ;;  %v1079_v47 = vld [vmem:[%s1405_s2 + $0x160] sm:$0xff]  }
   0xf   :  { %914 = vmatpush3.bf16.msra.mxu0 %v1054_v13  ;;  %v1078_v46 = vld [vmem:[%s1405_s2 + $0x128] sm:$0xff]   ;;  %v1080_v48 = vld [vmem:[%s1405_s2 + $0x120] sm:$0xff]   ;;  %v1081_v49 = vld [vmem:[%s1405_s2 + $0x158] sm:$0xff]  }
  0x10   :  { %915 = vmatprep.subr.bf16.mxu0 %v1057_v16  ;;  %478 = vmatprep.mubr.bf16.mxu0 %v37_v32  ;;  %v1082_v50 = vld [vmem:[%s1405_s2 + $0x118] sm:$0xff]   ;;  %v1083_v51 = vld [vmem:[%s1405_s2 + $0x150] sm:$0xff]   ;;  %v1089_v52 = vld [vmem:[%s1405_s2 + $0x180] sm:$0xff]  }
  0x11   :  { %936 = vmatpush3.bf16.msra.mxu1 %v1056_v15  ;;  %v34_v53 = vld [vmem:[%s1406_s1 + $0x28] sm:$0xff]  ;;  %v35_v55 = vld [vmem:[%s1406_s1 + $0x30] sm:$0xff]  ;;  %v1087_v60 = vld [vmem:[%s1405_s2 + $0x140] sm:$0xff]  }
  0x12   :  { %937 = vmatprep.subr.bf16.mxu1 %v1059_v18  ;;  %v41_v54 = vpack.c.bf16 %v34_v53, %v34_v53  ;;  %v1084_v56 = vld [vmem:[%s1405_s2 + $0x110] sm:$0xff]   ;;  %v42_v57 = vpack.c.bf16 %v35_v55, %v35_v55  ;;  %v1085_v58 = vld [vmem:[%s1405_s2 + $0x148] sm:$0xff]   ;;  %v1088_v61 = vld [vmem:[%s1405_s2 + $0x100] sm:$0xff]  }
  0x13   :  { %916 = vmatpush3.bf16.msra.mxu0 %v1058_v17  ;;  %v1086_v59 = vld [vmem:[%s1405_s2 + $0x108] sm:$0xff]   ;;  %v33_v62 = vld [vmem:[%s1406_s1 + $0x20] sm:$0xff]  ;;  %v1090_v0 = vld [vmem:[%s1407_s4 + $0x38] sm:$0xff]  }
  0x14   :  { %917 = vmatprep.subr.bf16.mxu0 %v1061_v20  ;;  %v40_v63 = vpack.c.bf16 %v33_v62, %v33_v62  ;;  %v1091_v1 = vld [vmem:[%s1407_s4 + $0x30] sm:$0xff]   ;;  %v1092_v2 = vld [vmem:[%s1407_s4 + $0x28] sm:$0xff]   ;;  %v1093_v3 = vld [vmem:[%s1407_s4 + $0x20] sm:$0xff]  }
  0x15   :  { %938 = vmatpush3.bf16.msra.mxu1 %v1060_v19  ;;  %v1094_v4 = vld [vmem:[%s1407_s4 + $0x18] sm:$0xff]   ;;  %v1095_v5 = vld [vmem:[%s1407_s4 + $0x10] sm:$0xff]   ;;  %v1096_v6 = vld [vmem:[%s1407_s4 + $0x8] sm:$0xff]  }
  0x16   :  { %939 = vmatprep.subr.bf16.mxu1 %v1063_v22  ;;  %v1097_v7 = vld [vmem:[%s1407_s4] sm:$0xff]   ;;  %v1098_v8 = vld [vmem:[%s1408_s6 + $0x38] sm:$0xff]   ;;  %v1099_v9 = vld [vmem:[%s1408_s6 + $0x30] sm:$0xff]  }
  0x17   :  { %918 = vmatpush3.bf16.msra.mxu0 %v1062_v21  ;;  %v1100_v10 = vld [vmem:[%s1408_s6 + $0x28] sm:$0xff]   ;;  %v1101_v11 = vld [vmem:[%s1408_s6 + $0x20] sm:$0xff]   ;;  %v1102_v12 = vld [vmem:[%s1408_s6 + $0x18] sm:$0xff]  }
  0x18   :  { %919 = vmatprep.subr.bf16.mxu0 %v1065_v24  ;;  %v1103_v13 = vld [vmem:[%s1408_s6 + $0x10] sm:$0xff]   ;;  %v1104_v40 = vld [vmem:[%s1408_s6 + $0x8] sm:$0xff]  }
  0x19   :  { %940 = vmatpush3.bf16.msra.mxu1 %v1064_v23 }
  0x1a   :  { %941 = vmatprep.subr.bf16.mxu1 %v1067_v26 }
  0x1b   :  { %920 = vmatpush3.bf16.msra.mxu0 %v1066_v25 }
  0x1c   :  { %921 = vmatprep.subr.bf16.mxu0 %v1069_v28 }
  0x1d   :  { %942 = vmatpush3.bf16.msra.mxu1 %v1068_v27  ;;  %v838_v27 = vld [vmem:[%s1409_s3] ss:$0 sm:$0xff] }
  0x1e   :  { %943 = vmatprep.subr.bf16.mxu1 %v1071_v30 }
  0x1f   :  { %922 = vmatpush3.bf16.msra.mxu0 %v1070_v29 }
  0x20   :  { %951 = vmatprep.subr.bf16.mxu0 %v1073_v36 }
  0x21   :  { %944 = vmatpush3.bf16.msra.mxu1 %v1072_v33 }
  0x22   :  { %479 = vmatmul.mubr.bf16.vlgmr.msra.gmra.mxu0 %v36_v35  ;;  %993 = vmatprep.subr.bf16.mxu1 %v1106_v44 }
  0x23   :  { %952 = vmatpush3.bf16.msra.mxu0 %v1074_v39  ;;  %558 = vmatprep.mubr.bf16.mxu0 %v41_v54 }
  0x24   :  { %519 = vmatmul.mubr.bf16.vlgmr.msra.gmra.mxu1 %v38_v41  ;;  %953 = vmatprep.subr.bf16.mxu0 %v1075_v42  ;;  %v1105_v41 = vld [vmem:[%s1408_s6] sm:$0xff]  }
  0x25   :  { %995 = vmatprep.mubr.msk.bf16.mxu1 %vm1107_vm0, %v1106_v44  ;;  %994 = vmatpush3.bf16.msra.mxu1 %v1089_v52  ;;  %v889_v42 = vld [vmem:[%s1410_s5] ss:$0 sm:$0xff] }
  0x26   :  { %999 = vmatprep.subr.bf16.mxu1 %v1106_v44 }
  0x27   :  { %954 = vmatpush3.bf16.msra.mxu0 %v1076_v43 }
  0x28   :  { %955 = vmatprep.subr.bf16.mxu0 %v1077_v45 }
  0x2b   :  { %956 = vmatpush3.bf16.msra.mxu0 %v1078_v46 }
  0x2c   :  { %957 = vmatprep.subr.bf16.mxu0 %v1079_v47  ;;  %996 = vmatmul.mubr.msk.bf16.vlgmr.msra.gmra.mxu1 %vm442_vm1, %v42_v57 }
  0x2d   :  { %1015 = vmatprep.mubr.msk.bf16.mxu1 %vm1107_vm0, %v1106_v44  ;;  %1000 = vmatpush3.bf16.msra.mxu1 %v1090_v0 }
  0x2e   :  { %1001 = vmatprep.subr.bf16.mxu1 %v1106_v44 }
  0x2f   :  { %958 = vmatpush3.bf16.msra.mxu0 %v1080_v48 }
  0x30   :  { %959 = vmatprep.subr.bf16.mxu0 %v1081_v49 }
  0x31   :  { %1002 = vmatpush3.bf16.msra.mxu1 %v1091_v1 }
  0x32   :  { %1003 = vmatprep.subr.bf16.mxu1 %v1106_v44 }
  0x33   :  { %960 = vmatpush3.bf16.msra.mxu0 %v1082_v50 }
  0x34   :  { %961 = vmatprep.subr.bf16.mxu0 %v1083_v51 }
  0x35   :  { %1004 = vmatpush3.bf16.msra.mxu1 %v1092_v2 }
  0x36   :  { %1005 = vmatprep.subr.bf16.mxu1 %v1106_v44 }
  0x37   :  { %962 = vmatpush3.bf16.msra.mxu0 %v1084_v56 }
  0x38   :  { %963 = vmatprep.subr.bf16.mxu0 %v1085_v58 }
  0x39   :  { %1006 = vmatpush3.bf16.msra.mxu1 %v1093_v3 }
  0x3a   :  { %1007 = vmatprep.subr.bf16.mxu1 %v1106_v44 }
  0x3b   :  { %964 = vmatpush3.bf16.msra.mxu0 %v1086_v59 }
  0x3c   :  { %965 = vmatprep.subr.bf16.mxu0 %v1087_v60 }
  0x3d   :  { %1008 = vmatpush3.bf16.msra.mxu1 %v1094_v4 }
  0x3e   :  { %1009 = vmatprep.subr.bf16.mxu1 %v1106_v44 }
  0x3f   :  { %966 = vmatpush3.bf16.msra.mxu0 %v1088_v61 }
  0x40   :  { %1019 = vmatprep.subr.bf16.mxu0 %v1106_v44 }
  0x41   :  { %1010 = vmatpush3.bf16.msra.mxu1 %v1095_v5 }
  0x42   :  { %559 = vmatmul.mubr.bf16.vlgmr.msra.gmra.mxu0 %v40_v63  ;;  %1011 = vmatprep.subr.bf16.mxu1 %v1106_v44 }
  0x43   :  { %1035 = vmatprep.mubr.msk.bf16.mxu0 %vm1107_vm0, %v1106_v44  ;;  %1020 = vmatpush3.bf16.msra.mxu0 %v1098_v8 }
  0x44   :  { %1021 = vmatprep.subr.bf16.mxu0 %v1106_v44 }
  0x45   :  { %1012 = vmatpush3.bf16.msra.mxu1 %v1096_v6 }
  0x46   :  { %1013 = vmatprep.subr.bf16.mxu1 %v1106_v44 }
  0x47   :  { %1022 = vmatpush3.bf16.msra.mxu0 %v1099_v9 }
  0x48   :  { %1023 = vmatprep.subr.bf16.mxu0 %v1106_v44 }
  0x49   :  { %1014 = vmatpush3.bf16.msra.mxu1 %v1097_v7 }
  0x4b   :  { %1024 = vmatpush3.bf16.msra.mxu0 %v1100_v10 }
  0x4c   :  { %1025 = vmatprep.subr.bf16.mxu0 %v1106_v44 }
  0x4f   :  { %1026 = vmatpush3.bf16.msra.mxu0 %v1101_v11 }
  0x50   :  { %1027 = vmatprep.subr.bf16.mxu0 %v1106_v44 }
  0x53   :  { %1028 = vmatpush3.bf16.msra.mxu0 %v1102_v12 }
  0x54   :  { %1029 = vmatprep.subr.bf16.mxu0 %v1106_v44 }
  0x57   :  { %1030 = vmatpush3.bf16.msra.mxu0 %v1103_v13 }
  0x58   :  { %1031 = vmatprep.subr.bf16.mxu0 %v1106_v44 }
  0x5b   :  { %1032 = vmatpush3.bf16.msra.mxu0 %v1104_v40 }
  0x5c   :  { %1033 = vmatprep.subr.bf16.mxu0 %v1106_v44  ;;  %v898_v44 = vld [vmem:[%s1411_s7] ss:$0 sm:$0xff] }
  0x5f   :  { %1034 = vmatpush3.bf16.msra.mxu0 %v1105_v41 }
  0xe2   :  { %v923_v14 = vpop.f32.mrf.mxu0 }
  0xe4   :  { %v924_v15 = vpop.f32.mrf.mxu0  ;;  %v945_v16 = vpop.f32.mrf.mxu1 }
  0xe5   :  { %v925_v26 = vadd.f32 %v924_v15, %v923_v14 }
  0xe6   :  { %v926_v17 = vpop.f32.mrf.mxu0  ;;  %v946_v18 = vpop.f32.mrf.mxu1 }
  0xe7   :  { %v481_v28 = vadd.f32 %v925_v26, %v838_v27  ;;  %v947_v29 = vadd.f32 %v946_v18, %v945_v16 }
  0xe8   :  { %v927_v19 = vpop.f32.mrf.mxu0  ;;  %v948_v20 = vpop.f32.mrf.mxu1 }
  0xe9   :  { %v521_v32 = vadd.f32 %v947_v29, %v481_v28 }
  0xea   :  { %v949_v21 = vpop.f32.mrf.mxu1 }
  0xec   :  { %v600_v22 = vpop.f32.mrf.mxu1 }
  0xee   :  { %v997_v23 = vpop.f32.mrf.mxu1 }
  0xf0   :  { %v603_v24 = vpop.f32.mrf.mxu1 }
  0xf2   :  { %v998_v25 = vpop.f32.mrf.mxu1 }
 0x102   :  { %v967_v30 = vpop.f32.mrf.mxu0 }
 0x104   :  { %v968_v31 = vpop.f32.mrf.mxu0 }
 0x105   :  { %v969_v33 = vadd.f32 %v968_v31, %v967_v30 }
 0x106   :  { %v970_v34 = vpop.f32.mrf.mxu0 }
 0x107   :  { %v561_v35 = vadd.f32 %v969_v33, %v521_v32 }
 0x108   :  { %v971_v36 = vpop.f32.mrf.mxu0 }
 0x109   :  { %v601_v37 = vadd.f32 %v600_v22, %v561_v35 }
 0x10b   :  { %v606_v38 = vmax.f32 %v601_v37, 0.0 }
 0x10d   :  { %v607_v39 = vpack.c.bf16 %v606_v38, %v606_v38 }
 0x10f   :  { %1016 = vmatmul.mubr.bf16.vlgmr.msra.gmra.mxu1 %v607_v39 }
 0x1cf   :  { %v713_v43 = vpop.f32.mrf.mxu1 }
 0x1d0   :  { %v714_v45 = vadd.f32 %v889_v42, %v713_v43 }
 0x1d1   :  { %v1017_v46 = vpop.f32.mrf.mxu1 }
 0x1d2   :  { %v719_v47 = vmax.f32 %v714_v45, 0.0 }
 0x1d3   :  { %v716_v48 = vpop.f32.mrf.mxu1 }
 0x1d4   :  { %v720_v49 = vpack.c.bf16 %v719_v47, %v719_v47 }
 0x1d5   :  { %v1018_v50 = vpop.f32.mrf.mxu1 }
 0x1d6   :  { %1036 = vmatmul.mubr.bf16.vlgmr.msra.gmra.mxu0 %v720_v49 }
 0x296   :  { %v826_v51 = vpop.f32.mrf.mxu0 }
 0x297   :  { %v827_v52 = vadd.f32 %v898_v44, %v826_v51 }
 0x298   :  { %v1037_v53 = vpop.f32.mrf.mxu0 }
 0x299   :  { %v832_v54 = vpack.c.bf16 %v827_v52, %v827_v52 }
 0x29a   :  { %v829_v55 = vpop.f32.mrf.mxu0 }
 0x29b   :  { %833 = vst [vmem:[%s1412_s8] sm:$0xf] %v832_v54 }
 0x29c   :  { %v1038_v56 = vpop.f32.mrf.mxu0 }

</bundles_post_ra>
